<compile_context>
chip_gen: v7x
topology: tpu7x:2x2x1
jax: 0.10.0
libtpu: 0.0.40
codegen_flags: <defaults>
</compile_context>

<pallas_src>
import math

import jax
import jax.numpy as jnp
from jax.experimental import pallas as pl
from jax.experimental.pallas import tpu as pltpu


def gru_kernel(x_ref, wxp_ref, bx_ref, whp_ref, bhn_ref, wf_ref, bf_ref, out_ref):
    """Whole GRU forward in one invocation.

    x_ref  : (S*Bp, D)  bf16  time-major input, batch padded to Bp (multiple of 8)
    wxp_ref: (D, Np)    bf16  packed input->hidden weights [r | z | n | 0-pad] along lanes
    bx_ref : (1, Np)    f32   bx with bh_r / bh_z folded in (n lanes carry bx_n only)
    whp_ref: (H, Np)    bf16  packed hidden->hidden weights [r | z | n | 0-pad]
    bhn_ref: (1, Np)    f32   b_hn in the n-gate lanes, zeros elsewhere
    wf_ref : (H, O)     f32   final Linear weight (in, out)
    bf_ref : (1, O)     f32
    out_ref: (Bp, O)    f32
    """
    SB = x_ref.shape[0]
    Bp = out_ref.shape[0]
    H = wf_ref.shape[0]
    S = SB // Bp

    # ---- Phase 1: hoisted packed input projection (one MXU matmul, M = S*Bp, N = Np). ----
    # bh_r / bh_z already folded into bx_ref; result stays vreg-resident (no VMEM scratch).
    gx_all = jnp.dot(x_ref[...], wxp_ref[...],
                     preferred_element_type=jnp.float32) + bx_ref[...]

    whp = whp_ref[...]          # (H, Np) bf16, loop-invariant
    bhn = bhn_ref[...]          # (1, Np): b_hn only in the n-gate lanes

    # ---- Phase 2: serial recurrence; hidden state is a register-resident carry. ----
    h = jnp.zeros((Bp, H), jnp.float32)
    for t in range(S):                                  # S static & small: full unroll
        gx = gx_all[t * Bp:(t + 1) * Bp, :]             # aligned static (Bp, Np) slice
        gh = jnp.dot(h.astype(jnp.bfloat16), whp,       # ONE packed bf16 matmul / step
                     preferred_element_type=jnp.float32) + bhn
        s = jax.nn.sigmoid(gx + gh)                     # one full-width EUP pass: r and z
        r = s[:, 0:H]                                   # resetgate
        z = s[:, H:2 * H]                               # inputgate (update)
        n = jnp.tanh(gx[:, 2 * H:3 * H] + r * gh[:, 2 * H:3 * H])   # newgate (b_hn inside)
        h = n + z * (h - n)                             # hy

    # ---- Phase 3: final Linear on the last hidden state. ----
    out = jnp.dot(h, wf_ref[...], preferred_element_type=jnp.float32) + bf_ref[...]
    out_ref[...] = out.astype(out_ref.dtype)


def gru_model_forward(x, params):
    """x: (batch, seq, input_dim) float32 -- same convention as the PyTorch forward."""
    wx, bx, wh, bh, wf, bf = (params["wx"], params["bx"], params["wh"],
                              params["bh"], params["wf"], params["bf"])
    B, S, D = x.shape
    H = wh.shape[-1]
    O = wf.shape[1]
    Bp = ((B + 7) // 8) * 8                      # pad batch to a full sublane tile
    Np = ((3 * H + 127) // 128) * 128            # packed-gate lane width (96 -> 128)

    # Time-major, batch-padded, bf16 input slab: rows [t*Bp : (t+1)*Bp] are timestep t.
    xp = jnp.pad(x, ((0, Bp - B), (0, 0), (0, 0)))
    x2 = jnp.transpose(xp, (1, 0, 2)).reshape(S * Bp, D).astype(jnp.bfloat16)

    def pack_w(w3):                              # (3, In, H) -> (In, Np), gates [r|z|n|pad]
        wp = jnp.concatenate([w3[0], w3[1], w3[2]], axis=1)
        return jnp.pad(wp, ((0, 0), (0, Np - 3 * H)))

    wx_p = pack_w(wx).astype(jnp.bfloat16)
    wh_p = pack_w(wh).astype(jnp.bfloat16)

    # Fold bh_r / bh_z into the Phase-1 bias; keep b_hn on the hidden projection
    # (it lives inside the r * (h_n + b_hn) product in PyTorch GRUCell).
    bx_fold = jnp.concatenate([bx[0] + bh[0], bx[1] + bh[1], bx[2]], axis=0)
    bx_fold = jnp.pad(bx_fold, (0, Np - 3 * H)).reshape(1, Np)
    zeros_h = jnp.zeros((H,), bh.dtype)
    bhn_pack = jnp.concatenate([zeros_h, zeros_h, bh[2]], axis=0)
    bhn_pack = jnp.pad(bhn_pack, (0, Np - 3 * H)).reshape(1, Np)

    vmem = pl.BlockSpec(memory_space=pltpu.MemorySpace.VMEM)
    out = pl.pallas_call(
        gru_kernel,
        out_shape=jax.ShapeDtypeStruct((Bp, O), jnp.float32),
        in_specs=[vmem] * 7,
        out_specs=vmem,
    )(x2, wx_p, bx_fold, wh_p, bhn_pack, wf, bf.reshape(1, O))
    return out[:B]     # padded rows carry bias-driven state; slice them off, never reduce.


def init_params(key, input_dim, hidden_dim, output_dim):
    """Matches GRUCell.reset_parameters (uniform(-std, std), std = 1/sqrt(H)) and the
    nn.Linear-style init for fc.  Weights stored per-gate, transposed to (in, out):
      wx: (3, D, H) [reset, update, new], wh: (3, H, H), bx/bh: (3, H), wf: (H, O)."""
    std = 1.0 / math.sqrt(hidden_dim)
    k = jax.random.split(key, 6)
    wx = jax.random.uniform(k[0], (3, input_dim, hidden_dim), jnp.float32, -std, std)
    bx = jax.random.uniform(k[1], (3, hidden_dim), jnp.float32, -std, std)
    wh = jax.random.uniform(k[2], (3, hidden_dim, hidden_dim), jnp.float32, -std, std)
    bh = jax.random.uniform(k[3], (3, hidden_dim), jnp.float32, -std, std)
    wf = jax.random.uniform(k[4], (hidden_dim, output_dim), jnp.float32, -std, std)
    bf = jax.random.uniform(k[5], (output_dim,), jnp.float32, -std, std)
    return dict(wx=wx, bx=bx, wh=wh, bh=bh, wf=wf, bf=bf)


def gru_model_reference(x, params, mxu_bf16=False):
    """Pure-JAX reference of the PyTorch forward (GRUCell loop + fc).
    mxu_bf16=True mirrors the kernel's bf16-in/f32-acc matmuls (x@Wx and h@Wh)."""
    wx, bx, wh, bh, wf, bf = (params["wx"], params["bx"], params["wh"],
                              params["bh"], params["wf"], params["bf"])
    B, S, D = x.shape
    H = wh.shape[-1]
    cast = (lambda a: a.astype(jnp.bfloat16)) if mxu_bf16 else (lambda a: a)
    h = jnp.zeros((B, H), jnp.float32)
    for t in range(S):
        xt = x[:, t, :]
        gx = [jnp.dot(cast(xt), cast(wx[g]), preferred_element_type=jnp.float32) + bx[g]
              for g in range(3)]
        gh = [jnp.dot(cast(h), cast(wh[g]), preferred_element_type=jnp.float32) + bh[g]
              for g in range(3)]
        r = jax.nn.sigmoid(gx[0] + gh[0])
        z = jax.nn.sigmoid(gx[1] + gh[1])
        n = jnp.tanh(gx[2] + r * gh[2])
        h = n + z * (h - n)
    return h @ wf + bf


if __name__ == "__main__":
    # fea_size (= input_dim = hidden_dim = output_dim); layer_dim=1 effective in the module.
    fea_size = 32
    batch, seq = 2, 8

    key = jax.random.PRNGKey(0)
    kx, kp = jax.random.split(key)
    x = jax.random.normal(kx, (batch, seq, fea_size), jnp.float32)
    params = init_params(kp, fea_size, fea_size, fea_size)

    out = jax.jit(gru_model_forward)(x, params)
    out = jax.block_until_ready(out)
    assert out.shape == (batch, fea_size)

    # Numerics-matched reference (same bf16 MXU inputs on x@Wx and h@Wh, f32 accumulation).
    ref_matched = gru_model_reference(x, params, mxu_bf16=True)
    assert jnp.allclose(out, ref_matched, atol=2e-3, rtol=2e-3), "mismatch vs matched ref"
    # Sanity check vs. the full-f32 PyTorch-equivalent forward (loose tol: bf16 MXU inputs).
    ref_f32 = gru_model_reference(x, params, mxu_bf16=False)
    assert jnp.allclose(out, ref_f32, atol=5e-2, rtol=5e-2), "mismatch vs f32 reference"

    print("KERNEL_OK")
</pallas_src>

<mosaic_0001>
module attributes {stable_mosaic.version = 11 : i64} {
  func.func @gru_kernel(%arg0: memref<64x32xbf16, #tpu.memory_space<vmem>>, %arg1: memref<32x128xbf16, #tpu.memory_space<vmem>>, %arg2: memref<1x128xf32, #tpu.memory_space<vmem>>, %arg3: memref<32x128xbf16, #tpu.memory_space<vmem>>, %arg4: memref<1x128xf32, #tpu.memory_space<vmem>>, %arg5: memref<32x32xf32, #tpu.memory_space<vmem>>, %arg6: memref<1x32xf32, #tpu.memory_space<vmem>>, %arg7: memref<8x32xf32, #tpu.memory_space<vmem>>) attributes {dimension_semantics = [], scalar_prefetch = 0 : i64, scratch_operands = 0 : i64, tpu.core_type = #tpu.core_type<tc>} {
    %c0 = arith.constant 0 : index
    %c0_0 = arith.constant 0 : index
    %0 = vector.load %arg0[%c0, %c0_0] : memref<64x32xbf16, #tpu.memory_space<vmem>>, vector<64x32xbf16>
    %c0_1 = arith.constant 0 : index
    %c0_2 = arith.constant 0 : index
    %1 = vector.load %arg1[%c0_1, %c0_2] : memref<32x128xbf16, #tpu.memory_space<vmem>>, vector<32x128xbf16>
    %cst = arith.constant dense<0.000000e+00> : vector<64x128xf32>
    %2 = tpu.matmul %0, %1, %cst {dimension_numbers = #tpu.dot_dimension_numbers<[1], [0], [0], [1], [0, 0, 1, 1], [], []>} : vector<64x32xbf16>, vector<32x128xbf16>, vector<64x128xf32> -> vector<64x128xf32>
    %c0_3 = arith.constant 0 : index
    %c0_4 = arith.constant 0 : index
    %3 = vector.load %arg2[%c0_3, %c0_4] : memref<1x128xf32, #tpu.memory_space<vmem>>, vector<1x128xf32>
    %4 = vector.broadcast %3 : vector<1x128xf32> to vector<64x128xf32>
    %5 = arith.addf %2, %4 : vector<64x128xf32>
    %c0_5 = arith.constant 0 : index
    %c0_6 = arith.constant 0 : index
    %6 = vector.load %arg3[%c0_5, %c0_6] : memref<32x128xbf16, #tpu.memory_space<vmem>>, vector<32x128xbf16>
    %c0_7 = arith.constant 0 : index
    %c0_8 = arith.constant 0 : index
    %7 = vector.load %arg4[%c0_7, %c0_8] : memref<1x128xf32, #tpu.memory_space<vmem>>, vector<1x128xf32>
    %cst_9 = arith.constant 0.000000e+00 : f32
    %8 = vector.broadcast %cst_9 : f32 to vector<8x32xf32>
    %9 = vector.extract_strided_slice %5 {offsets = [0, 0], sizes = [8, 128], strides = [1, 1]} : vector<64x128xf32> to vector<8x128xf32>
    %10 = arith.truncf %8 : vector<8x32xf32> to vector<8x32xbf16>
    %cst_10 = arith.constant dense<0.000000e+00> : vector<8x128xf32>
    %11 = tpu.matmul %10, %6, %cst_10 {dimension_numbers = #tpu.dot_dimension_numbers<[1], [0], [0], [1], [0, 0, 1, 1], [], []>} : vector<8x32xbf16>, vector<32x128xbf16>, vector<8x128xf32> -> vector<8x128xf32>
    %12 = vector.broadcast %7 : vector<1x128xf32> to vector<8x128xf32>
    %13 = arith.addf %11, %12 : vector<8x128xf32>
    %14 = arith.addf %9, %13 : vector<8x128xf32>
    %15 = arith.negf %14 : vector<8x128xf32>
    %16 = math.exp %15 : vector<8x128xf32>
    %cst_11 = arith.constant 1.000000e+00 : f32
    %17 = vector.broadcast %cst_11 : f32 to vector<8x128xf32>
    %18 = arith.addf %17, %16 : vector<8x128xf32>
    %19 = arith.divf %17, %18 : vector<8x128xf32>
    %20 = vector.extract_strided_slice %19 {offsets = [0, 0], sizes = [8, 32], strides = [1, 1]} : vector<8x128xf32> to vector<8x32xf32>
    %21 = vector.extract_strided_slice %19 {offsets = [0, 32], sizes = [8, 32], strides = [1, 1]} : vector<8x128xf32> to vector<8x32xf32>
    %22 = vector.extract_strided_slice %9 {offsets = [0, 64], sizes = [8, 32], strides = [1, 1]} : vector<8x128xf32> to vector<8x32xf32>
    %23 = vector.extract_strided_slice %13 {offsets = [0, 64], sizes = [8, 32], strides = [1, 1]} : vector<8x128xf32> to vector<8x32xf32>
    %24 = arith.mulf %20, %23 : vector<8x32xf32>
    %25 = arith.addf %22, %24 : vector<8x32xf32>
    %26 = math.tanh %25 : vector<8x32xf32>
    %27 = arith.subf %8, %26 : vector<8x32xf32>
    %28 = arith.mulf %21, %27 : vector<8x32xf32>
    %29 = arith.addf %26, %28 : vector<8x32xf32>
    %30 = vector.extract_strided_slice %5 {offsets = [8, 0], sizes = [8, 128], strides = [1, 1]} : vector<64x128xf32> to vector<8x128xf32>
    %31 = arith.truncf %29 : vector<8x32xf32> to vector<8x32xbf16>
    %cst_12 = arith.constant dense<0.000000e+00> : vector<8x128xf32>
    %32 = tpu.matmul %31, %6, %cst_12 {dimension_numbers = #tpu.dot_dimension_numbers<[1], [0], [0], [1], [0, 0, 1, 1], [], []>} : vector<8x32xbf16>, vector<32x128xbf16>, vector<8x128xf32> -> vector<8x128xf32>
    %33 = vector.broadcast %7 : vector<1x128xf32> to vector<8x128xf32>
    %34 = arith.addf %32, %33 : vector<8x128xf32>
    %35 = arith.addf %30, %34 : vector<8x128xf32>
    %36 = arith.negf %35 : vector<8x128xf32>
    %37 = math.exp %36 : vector<8x128xf32>
    %cst_13 = arith.constant 1.000000e+00 : f32
    %38 = vector.broadcast %cst_13 : f32 to vector<8x128xf32>
    %39 = arith.addf %38, %37 : vector<8x128xf32>
    %40 = arith.divf %38, %39 : vector<8x128xf32>
    %41 = vector.extract_strided_slice %40 {offsets = [0, 0], sizes = [8, 32], strides = [1, 1]} : vector<8x128xf32> to vector<8x32xf32>
    %42 = vector.extract_strided_slice %40 {offsets = [0, 32], sizes = [8, 32], strides = [1, 1]} : vector<8x128xf32> to vector<8x32xf32>
    %43 = vector.extract_strided_slice %30 {offsets = [0, 64], sizes = [8, 32], strides = [1, 1]} : vector<8x128xf32> to vector<8x32xf32>
    %44 = vector.extract_strided_slice %34 {offsets = [0, 64], sizes = [8, 32], strides = [1, 1]} : vector<8x128xf32> to vector<8x32xf32>
    %45 = arith.mulf %41, %44 : vector<8x32xf32>
    %46 = arith.addf %43, %45 : vector<8x32xf32>
    %47 = math.tanh %46 : vector<8x32xf32>
    %48 = arith.subf %29, %47 : vector<8x32xf32>
    %49 = arith.mulf %42, %48 : vector<8x32xf32>
    %50 = arith.addf %47, %49 : vector<8x32xf32>
    %51 = vector.extract_strided_slice %5 {offsets = [16, 0], sizes = [8, 128], strides = [1, 1]} : vector<64x128xf32> to vector<8x128xf32>
    %52 = arith.truncf %50 : vector<8x32xf32> to vector<8x32xbf16>
    %cst_14 = arith.constant dense<0.000000e+00> : vector<8x128xf32>
    %53 = tpu.matmul %52, %6, %cst_14 {dimension_numbers = #tpu.dot_dimension_numbers<[1], [0], [0], [1], [0, 0, 1, 1], [], []>} : vector<8x32xbf16>, vector<32x128xbf16>, vector<8x128xf32> -> vector<8x128xf32>
    %54 = vector.broadcast %7 : vector<1x128xf32> to vector<8x128xf32>
    %55 = arith.addf %53, %54 : vector<8x128xf32>
    %56 = arith.addf %51, %55 : vector<8x128xf32>
    %57 = arith.negf %56 : vector<8x128xf32>
    %58 = math.exp %57 : vector<8x128xf32>
    %cst_15 = arith.constant 1.000000e+00 : f32
    %59 = vector.broadcast %cst_15 : f32 to vector<8x128xf32>
    %60 = arith.addf %59, %58 : vector<8x128xf32>
    %61 = arith.divf %59, %60 : vector<8x128xf32>
    %62 = vector.extract_strided_slice %61 {offsets = [0, 0], sizes = [8, 32], strides = [1, 1]} : vector<8x128xf32> to vector<8x32xf32>
    %63 = vector.extract_strided_slice %61 {offsets = [0, 32], sizes = [8, 32], strides = [1, 1]} : vector<8x128xf32> to vector<8x32xf32>
    %64 = vector.extract_strided_slice %51 {offsets = [0, 64], sizes = [8, 32], strides = [1, 1]} : vector<8x128xf32> to vector<8x32xf32>
    %65 = vector.extract_strided_slice %55 {offsets = [0, 64], sizes = [8, 32], strides = [1, 1]} : vector<8x128xf32> to vector<8x32xf32>
    %66 = arith.mulf %62, %65 : vector<8x32xf32>
    %67 = arith.addf %64, %66 : vector<8x32xf32>
    %68 = math.tanh %67 : vector<8x32xf32>
    %69 = arith.subf %50, %68 : vector<8x32xf32>
    %70 = arith.mulf %63, %69 : vector<8x32xf32>
    %71 = arith.addf %68, %70 : vector<8x32xf32>
    %72 = vector.extract_strided_slice %5 {offsets = [24, 0], sizes = [8, 128], strides = [1, 1]} : vector<64x128xf32> to vector<8x128xf32>
    %73 = arith.truncf %71 : vector<8x32xf32> to vector<8x32xbf16>
    %cst_16 = arith.constant dense<0.000000e+00> : vector<8x128xf32>
    %74 = tpu.matmul %73, %6, %cst_16 {dimension_numbers = #tpu.dot_dimension_numbers<[1], [0], [0], [1], [0, 0, 1, 1], [], []>} : vector<8x32xbf16>, vector<32x128xbf16>, vector<8x128xf32> -> vector<8x128xf32>
    %75 = vector.broadcast %7 : vector<1x128xf32> to vector<8x128xf32>
    %76 = arith.addf %74, %75 : vector<8x128xf32>
    %77 = arith.addf %72, %76 : vector<8x128xf32>
    %78 = arith.negf %77 : vector<8x128xf32>
    %79 = math.exp %78 : vector<8x128xf32>
    %cst_17 = arith.constant 1.000000e+00 : f32
    %80 = vector.broadcast %cst_17 : f32 to vector<8x128xf32>
    %81 = arith.addf %80, %79 : vector<8x128xf32>
    %82 = arith.divf %80, %81 : vector<8x128xf32>
    %83 = vector.extract_strided_slice %82 {offsets = [0, 0], sizes = [8, 32], strides = [1, 1]} : vector<8x128xf32> to vector<8x32xf32>
    %84 = vector.extract_strided_slice %82 {offsets = [0, 32], sizes = [8, 32], strides = [1, 1]} : vector<8x128xf32> to vector<8x32xf32>
    %85 = vector.extract_strided_slice %72 {offsets = [0, 64], sizes = [8, 32], strides = [1, 1]} : vector<8x128xf32> to vector<8x32xf32>
    %86 = vector.extract_strided_slice %76 {offsets = [0, 64], sizes = [8, 32], strides = [1, 1]} : vector<8x128xf32> to vector<8x32xf32>
    %87 = arith.mulf %83, %86 : vector<8x32xf32>
    %88 = arith.addf %85, %87 : vector<8x32xf32>
    %89 = math.tanh %88 : vector<8x32xf32>
    %90 = arith.subf %71, %89 : vector<8x32xf32>
    %91 = arith.mulf %84, %90 : vector<8x32xf32>
    %92 = arith.addf %89, %91 : vector<8x32xf32>
    %93 = vector.extract_strided_slice %5 {offsets = [32, 0], sizes = [8, 128], strides = [1, 1]} : vector<64x128xf32> to vector<8x128xf32>
    %94 = arith.truncf %92 : vector<8x32xf32> to vector<8x32xbf16>
    %cst_18 = arith.constant dense<0.000000e+00> : vector<8x128xf32>
    %95 = tpu.matmul %94, %6, %cst_18 {dimension_numbers = #tpu.dot_dimension_numbers<[1], [0], [0], [1], [0, 0, 1, 1], [], []>} : vector<8x32xbf16>, vector<32x128xbf16>, vector<8x128xf32> -> vector<8x128xf32>
    %96 = vector.broadcast %7 : vector<1x128xf32> to vector<8x128xf32>
    %97 = arith.addf %95, %96 : vector<8x128xf32>
    %98 = arith.addf %93, %97 : vector<8x128xf32>
    %99 = arith.negf %98 : vector<8x128xf32>
    %100 = math.exp %99 : vector<8x128xf32>
    %cst_19 = arith.constant 1.000000e+00 : f32
    %101 = vector.broadcast %cst_19 : f32 to vector<8x128xf32>
    %102 = arith.addf %101, %100 : vector<8x128xf32>
    %103 = arith.divf %101, %102 : vector<8x128xf32>
    %104 = vector.extract_strided_slice %103 {offsets = [0, 0], sizes = [8, 32], strides = [1, 1]} : vector<8x128xf32> to vector<8x32xf32>
    %105 = vector.extract_strided_slice %103 {offsets = [0, 32], sizes = [8, 32], strides = [1, 1]} : vector<8x128xf32> to vector<8x32xf32>
    %106 = vector.extract_strided_slice %93 {offsets = [0, 64], sizes = [8, 32], strides = [1, 1]} : vector<8x128xf32> to vector<8x32xf32>
    %107 = vector.extract_strided_slice %97 {offsets = [0, 64], sizes = [8, 32], strides = [1, 1]} : vector<8x128xf32> to vector<8x32xf32>
    %108 = arith.mulf %104, %107 : vector<8x32xf32>
    %109 = arith.addf %106, %108 : vector<8x32xf32>
    %110 = math.tanh %109 : vector<8x32xf32>
    %111 = arith.subf %92, %110 : vector<8x32xf32>
    %112 = arith.mulf %105, %111 : vector<8x32xf32>
    %113 = arith.addf %110, %112 : vector<8x32xf32>
    %114 = vector.extract_strided_slice %5 {offsets = [40, 0], sizes = [8, 128], strides = [1, 1]} : vector<64x128xf32> to vector<8x128xf32>
    %115 = arith.truncf %113 : vector<8x32xf32> to vector<8x32xbf16>
    %cst_20 = arith.constant dense<0.000000e+00> : vector<8x128xf32>
    %116 = tpu.matmul %115, %6, %cst_20 {dimension_numbers = #tpu.dot_dimension_numbers<[1], [0], [0], [1], [0, 0, 1, 1], [], []>} : vector<8x32xbf16>, vector<32x128xbf16>, vector<8x128xf32> -> vector<8x128xf32>
    %117 = vector.broadcast %7 : vector<1x128xf32> to vector<8x128xf32>
    %118 = arith.addf %116, %117 : vector<8x128xf32>
    %119 = arith.addf %114, %118 : vector<8x128xf32>
    %120 = arith.negf %119 : vector<8x128xf32>
    %121 = math.exp %120 : vector<8x128xf32>
    %cst_21 = arith.constant 1.000000e+00 : f32
    %122 = vector.broadcast %cst_21 : f32 to vector<8x128xf32>
    %123 = arith.addf %122, %121 : vector<8x128xf32>
    %124 = arith.divf %122, %123 : vector<8x128xf32>
    %125 = vector.extract_strided_slice %124 {offsets = [0, 0], sizes = [8, 32], strides = [1, 1]} : vector<8x128xf32> to vector<8x32xf32>
    %126 = vector.extract_strided_slice %124 {offsets = [0, 32], sizes = [8, 32], strides = [1, 1]} : vector<8x128xf32> to vector<8x32xf32>
    %127 = vector.extract_strided_slice %114 {offsets = [0, 64], sizes = [8, 32], strides = [1, 1]} : vector<8x128xf32> to vector<8x32xf32>
    %128 = vector.extract_strided_slice %118 {offsets = [0, 64], sizes = [8, 32], strides = [1, 1]} : vector<8x128xf32> to vector<8x32xf32>
    %129 = arith.mulf %125, %128 : vector<8x32xf32>
    %130 = arith.addf %127, %129 : vector<8x32xf32>
    %131 = math.tanh %130 : vector<8x32xf32>
    %132 = arith.subf %113, %131 : vector<8x32xf32>
    %133 = arith.mulf %126, %132 : vector<8x32xf32>
    %134 = arith.addf %131, %133 : vector<8x32xf32>
    %135 = vector.extract_strided_slice %5 {offsets = [48, 0], sizes = [8, 128], strides = [1, 1]} : vector<64x128xf32> to vector<8x128xf32>
    %136 = arith.truncf %134 : vector<8x32xf32> to vector<8x32xbf16>
    %cst_22 = arith.constant dense<0.000000e+00> : vector<8x128xf32>
    %137 = tpu.matmul %136, %6, %cst_22 {dimension_numbers = #tpu.dot_dimension_numbers<[1], [0], [0], [1], [0, 0, 1, 1], [], []>} : vector<8x32xbf16>, vector<32x128xbf16>, vector<8x128xf32> -> vector<8x128xf32>
    %138 = vector.broadcast %7 : vector<1x128xf32> to vector<8x128xf32>
    %139 = arith.addf %137, %138 : vector<8x128xf32>
    %140 = arith.addf %135, %139 : vector<8x128xf32>
    %141 = arith.negf %140 : vector<8x128xf32>
    %142 = math.exp %141 : vector<8x128xf32>
    %cst_23 = arith.constant 1.000000e+00 : f32
    %143 = vector.broadcast %cst_23 : f32 to vector<8x128xf32>
    %144 = arith.addf %143, %142 : vector<8x128xf32>
    %145 = arith.divf %143, %144 : vector<8x128xf32>
    %146 = vector.extract_strided_slice %145 {offsets = [0, 0], sizes = [8, 32], strides = [1, 1]} : vector<8x128xf32> to vector<8x32xf32>
    %147 = vector.extract_strided_slice %145 {offsets = [0, 32], sizes = [8, 32], strides = [1, 1]} : vector<8x128xf32> to vector<8x32xf32>
    %148 = vector.extract_strided_slice %135 {offsets = [0, 64], sizes = [8, 32], strides = [1, 1]} : vector<8x128xf32> to vector<8x32xf32>
    %149 = vector.extract_strided_slice %139 {offsets = [0, 64], sizes = [8, 32], strides = [1, 1]} : vector<8x128xf32> to vector<8x32xf32>
    %150 = arith.mulf %146, %149 : vector<8x32xf32>
    %151 = arith.addf %148, %150 : vector<8x32xf32>
    %152 = math.tanh %151 : vector<8x32xf32>
    %153 = arith.subf %134, %152 : vector<8x32xf32>
    %154 = arith.mulf %147, %153 : vector<8x32xf32>
    %155 = arith.addf %152, %154 : vector<8x32xf32>
    %156 = vector.extract_strided_slice %5 {offsets = [56, 0], sizes = [8, 128], strides = [1, 1]} : vector<64x128xf32> to vector<8x128xf32>
    %157 = arith.truncf %155 : vector<8x32xf32> to vector<8x32xbf16>
    %cst_24 = arith.constant dense<0.000000e+00> : vector<8x128xf32>
    %158 = tpu.matmul %157, %6, %cst_24 {dimension_numbers = #tpu.dot_dimension_numbers<[1], [0], [0], [1], [0, 0, 1, 1], [], []>} : vector<8x32xbf16>, vector<32x128xbf16>, vector<8x128xf32> -> vector<8x128xf32>
    %159 = vector.broadcast %7 : vector<1x128xf32> to vector<8x128xf32>
    %160 = arith.addf %158, %159 : vector<8x128xf32>
    %161 = arith.addf %156, %160 : vector<8x128xf32>
    %162 = arith.negf %161 : vector<8x128xf32>
    %163 = math.exp %162 : vector<8x128xf32>
    %cst_25 = arith.constant 1.000000e+00 : f32
    %164 = vector.broadcast %cst_25 : f32 to vector<8x128xf32>
    %165 = arith.addf %164, %163 : vector<8x128xf32>
    %166 = arith.divf %164, %165 : vector<8x128xf32>
    %167 = vector.extract_strided_slice %166 {offsets = [0, 0], sizes = [8, 32], strides = [1, 1]} : vector<8x128xf32> to vector<8x32xf32>
    %168 = vector.extract_strided_slice %166 {offsets = [0, 32], sizes = [8, 32], strides = [1, 1]} : vector<8x128xf32> to vector<8x32xf32>
    %169 = vector.extract_strided_slice %156 {offsets = [0, 64], sizes = [8, 32], strides = [1, 1]} : vector<8x128xf32> to vector<8x32xf32>
    %170 = vector.extract_strided_slice %160 {offsets = [0, 64], sizes = [8, 32], strides = [1, 1]} : vector<8x128xf32> to vector<8x32xf32>
    %171 = arith.mulf %167, %170 : vector<8x32xf32>
    %172 = arith.addf %169, %171 : vector<8x32xf32>
    %173 = math.tanh %172 : vector<8x32xf32>
    %174 = arith.subf %155, %173 : vector<8x32xf32>
    %175 = arith.mulf %168, %174 : vector<8x32xf32>
    %176 = arith.addf %173, %175 : vector<8x32xf32>
    %c0_26 = arith.constant 0 : index
    %c0_27 = arith.constant 0 : index
    %177 = vector.load %arg5[%c0_26, %c0_27] : memref<32x32xf32, #tpu.memory_space<vmem>>, vector<32x32xf32>
    %cst_28 = arith.constant dense<0.000000e+00> : vector<8x32xf32>
    %178 = tpu.matmul %176, %177, %cst_28 {dimension_numbers = #tpu.dot_dimension_numbers<[1], [0], [0], [1], [0, 0, 1, 1], [], []>} : vector<8x32xf32>, vector<32x32xf32>, vector<8x32xf32> -> vector<8x32xf32>
    %c0_29 = arith.constant 0 : index
    %c0_30 = arith.constant 0 : index
    %179 = vector.load %arg6[%c0_29, %c0_30] : memref<1x32xf32, #tpu.memory_space<vmem>>, vector<1x32xf32>
    %180 = vector.broadcast %179 : vector<1x32xf32> to vector<8x32xf32>
    %181 = arith.addf %178, %180 : vector<8x32xf32>
    %c0_31 = arith.constant 0 : index
    %c0_32 = arith.constant 0 : index
    %182 = vector.load %arg7[%c0_31, %c0_32] : memref<8x32xf32, #tpu.memory_space<vmem>>, vector<8x32xf32>
    tpu.vector_store %arg7[%c0_31, %c0_32], %181 {strides = array<i32>} : memref<8x32xf32, #tpu.memory_space<vmem>>, vector<8x32xf32>,
    return
  }
}

</mosaic_0001>

<bundles_post_ra>
// kernel: gru_model_forward.1
= control target key start
LH: loop header
LB: loop body
LE: loop exit
PB: predicated region body
PF: predicated region fallthrough
CT: control target
= control target key end

     0   :  { %v1096_v0 = vmov 0.0   ;;  %vm1097_vm0 = vmmov 0   ;;  %vm78_vm1 = vcmask 261120   ;;  %v1098_v7 = vmov 0   ;;  %s1099_s13 = smov 64   ;;  %s1336_s1 = inlined_call_operand.vmem [shape: bf16[32,128], index: 1, kind: input, shape index: {}]   ;;  %s1337_s3 = inlined_call_operand.vmem [shape: bf16[32,128], index: 3, kind: input, shape index: {}]   ;;  %s1338_s0 = inlined_call_operand.vmem [shape: bf16[64,32], index: 0, kind: input, shape index: {}]   ;;  %s1339_s4 = inlined_call_operand.vmem [shape: f32[1,128], index: 4, kind: input, shape index: {}]   ;;  %s1340_s2 = inlined_call_operand.vmem [shape: f32[1,128], index: 2, kind: input, shape index: {}]   ;;  %s1341_s5 = inlined_call_operand.vmem [shape: f32[32,32], index: 5, kind: input, shape index: {}]   ;;  %s1342_s6 = inlined_call_operand.vmem [shape: f32[1,32], index: 6, kind: input, shape index: {}]   ;;  %s1343_s7 = inlined_call_operand.vmem [shape: f32[8,32], index: 7, kind: output, shape index: {}]  }
   0x1   :  { %952 = vmatprep.subr.bf16.mxu1 %v1096_v0  ;;  %v1040_v1 = vld [vmem:[%s1336_s1] sm:$0xff]   ;;  %956 = vmatprep.mubr.msk.bf16.mxu1 %vm1097_vm0, %v1096_v0  ;;  %v1042_v3 = vld [vmem:[%s1336_s1 + $0x8] sm:$0xff]   ;;  %v1046_v54 = vld [vmem:[%s1338_s0 + $0x10] sm:$0xff]  }
   0x2   :  { %v1152_v2 = vld [vmem:[%s1337_s3] sm:$0xff]   ;;  %940 = vmatprep.subr.bf16.mxu0 %v1040_v1  ;;  %v1161_v4 = vld [vmem:[%s1337_s3 + $0x8] sm:$0xff]   ;;  %v1047_v55 = vld [vmem:[%s1338_s0 + $0x18] sm:$0xff]  }
   0x3   :  { %953 = vmatpush3.bf16.msra.mxu1 %v1152_v2  ;;  %941 = vmatpush3.bf16.msra.mxu0 %v1040_v1  ;;  %v1044_v5 = vld [vmem:[%s1338_s0] sm:$0xff]   ;;  %v1045_v6 = vld [vmem:[%s1338_s0 + $0x8] sm:$0xff]  }
   0x4   :  { %954 = vmatprep.subr.bf16.mxu1 %v1096_v0  ;;  %942 = vmatprep.subr.bf16.mxu0 %v1042_v3  ;;  %v1188_v8 = vld [vmem:[%s1339_s4] ss:$0 sm:$0xff]  ;;  %s1101_s4 = smov 32  }
   0x5   :  { %944 = vmatprep.mubr.msk.bf16.mxu0 %vm78_vm1, %v1044_v5  ;;  %v1199_v18 = vld [vmem:[%s1340_s2] ss:$0 sm:$0xff]  ;;  %s1100_s2 = smov 96  }
   0x7   :  { %955 = vmatpush3.bf16.msra.mxu1 %v1161_v4  ;;  %943 = vmatpush3.bf16.msra.mxu0 %v1042_v3 }
   0x8   :  { %960 = vmatprep.subr.bf16.mxu1 %v1096_v0  ;;  %968 = vmatprep.subr.bf16.mxu0 %v1096_v0 }
   0xa   :  { %957 = vmatmul.mubr.bf16.vlgmr.msra.gmra.mrb[0].mxu1 %v1098_v7  ;;  %945 = vmatmul.mubr.msk.bf16.vlgmr.msra.gmra.mrb[0].mxu0 %vm78_vm1, %v1045_v6 }
   0xb   :  { %961 = vmatpush3.bf16.msra.mxu1 %v1152_v2  ;;  %964 = vmatprep.mubr.msk.bf16.mxu1 %vm1097_vm0, %v1096_v0 }
   0xc   :  { %962 = vmatprep.subr.bf16.mxu1 %v1096_v0  ;;  %969 = vmatpush3.bf16.msra.mxu0 %v1152_v2 }
   0xd   :  { %970 = vmatprep.subr.bf16.mxu0 %v1096_v0  ;;  %948 = vmatprep.mubr.msk.bf16.mxu0 %vm78_vm1, %v1046_v54 }
   0xf   :  { %963 = vmatpush3.bf16.msra.mxu1 %v1161_v4 }
  0x10   :  { %971 = vmatpush3.bf16.msra.mxu0 %v1161_v4  ;;  %976 = vmatprep.subr.bf16.mxu1 %v1096_v0 }
  0x11   :  { %984 = vmatprep.subr.bf16.mxu0 %v1096_v0 }
  0x12   :  { %949 = vmatmul.mubr.msk.bf16.gmra.mrb[4].mxu0 %vm78_vm1, %v1047_v55 }
  0x13   :  { %972 = vmatprep.mubr.msk.bf16.mxu0 %vm1097_vm0, %v1096_v0 }
  0xdd   :  { %v216_v9 = vpop.f32.mrb[0].mxu1  ;;  %v1190_v10 = vpop.f32.mrb[0].mxu0 }
  0xde   :  { %v217_v11 = vadd.f32 %v1188_v8, %v216_v9  ;;  %v958_v12 = vpop.f32.mrb[1].mxu1  ;;  %v125_v13 = vpop.f32.mrb[1].mxu0 }
  0xdf   :  { %v219_v14 = vpop.f32.mrb[2].mxu1  ;;  %v1193_v15 = vpop.f32.mrb[2].mxu0  ;;  %v126_v19 = vadd.f32 %v1199_v18, %v125_v13  ;;  %v134_v12 = vadd.f32 %v1190_v10, %v1199_v18 }
  0xe0   :  { %230 = vrot.lane.b32.xlu0 %v217_v11, %s1099_s13  ;;  %v959_v16 = vpop.f32.mrb[3].mxu1  ;;  %v128_v17 = vpop.f32.mrb[3].mxu0 }
  0xe1   :  { %v222_v20 = vadd.f32 %v217_v11, %v126_v19  ;;  %v129_v42 = vadd.f32 %v1199_v18, %v128_v17 }
  0xe3   :  { %v888_v21 = vmul.f32 -1.442695, %v222_v20 }
  0xe5   :  { %1048 = vpow2.f32 %v888_v21  ;;  %v1230_v61 = vpop.f32.mrb[4].mxu0 }
  0xe6   :  { %v1232_v62 = vpop.f32.mrb[5].mxu0 }
  0xe7   :  { %v1234_v63 = vpop.f32.mrb[6].mxu0 }
  0xe8   :  { %v1236_v1 = vpop.f32.mrb[7].mxu0 }
  0xef   :  { %v1049_v22 = vpop.eup %1048 }
  0xf0   :  { %v226_v23 = vadd.f32 1.0, %v1049_v22 }
  0xf2   :  { %1050 = vrcp.f32 %v226_v23 }
  0xfc   :  { %v1051_v24 = vpop.eup %1050 }
 0x152   :  { %v231_v25 = vpop.permute.xlu0 %230 }
 0x153   :  { %v233_v26 = vmul.f32 %v1051_v24, %v231_v25 }
 0x155   :  { %235 = vrot.lane.b32.xlu0 %v233_v26, %s1099_s13 }
 0x1c7   :  { %v236_v27 = vpop.permute.xlu0 %235 }
 0x1c8   :  { %v238_v28 = vadd.f32 %v236_v27, %v126_v19 }
 0x1ca   :  { %1052 = vtanh.f32 %v238_v28 }
 0x1d4   :  { %v1053_v29 = vpop.eup %1052 }
 0x1d5   :  { %v240_v30 = vsub.f32 0.0, %v1053_v29 }
 0x1d7   :  { %242 = vrot.lane.b32.xlu1 %v240_v30, %s1100_s2 }
 0x249   :  { %v243_v31 = vpop.permute.xlu1 %242 }
 0x24a   :  { %v245_v32 = vmul.f32 %v1051_v24, %v243_v31 }
 0x24c   :  { %247 = vrot.lane.b32.xlu1 %v245_v32, %s1101_s4 }
 0x2be   :  { %v248_v33 = vpop.permute.xlu1 %247 }
 0x2bf   :  { %v250_v34 = vadd.f32 %v1053_v29, %v248_v33 }
 0x2c1   :  { %v251_v35 = vpack.c.bf16 %v250_v34, %v250_v34 }
 0x2c3   :  { %253 = vrot.lane.b32.xlu0 %v251_v35, %s1099_s13 }
 0x335   :  { %v254_v36 = vpop.permute.xlu0 %253 }
 0x336   :  { %965 = vmatmul.mubr.msk.bf16.vlgmr.msra.gmra.mrb[4].mxu1 %vm78_vm1, %v254_v36  ;;  %v137_v36 = vadd.f32 %v1193_v15, %v1199_v18 }
 0x337   :  { %977 = vmatpush3.bf16.msra.mxu1 %v1152_v2  ;;  %980 = vmatprep.mubr.msk.bf16.mxu1 %vm1097_vm0, %v1096_v0 }
 0x338   :  { %978 = vmatprep.subr.bf16.mxu1 %v1096_v0 }
 0x33b   :  { %979 = vmatpush3.bf16.msra.mxu1 %v1161_v4 }
 0x33c   :  { %992 = vmatprep.subr.bf16.mxu1 %v1096_v0 }
 0x409   :  { %v292_v37 = vpop.f32.mrb[4].mxu1 }
 0x40a   :  { %v293_v38 = vadd.f32 %v1188_v8, %v292_v37  ;;  %v966_v39 = vpop.f32.mrb[5].mxu1 }
 0x40b   :  { %v295_v40 = vpop.f32.mrb[6].mxu1 }
 0x40c   :  { %306 = vrot.lane.b32.xlu1 %v293_v38, %s1099_s13  ;;  %v967_v41 = vpop.f32.mrb[7].mxu1  ;;  %v298_v43 = vadd.f32 %v293_v38, %v129_v42 }
 0x40e   :  { %v890_v44 = vmul.f32 -1.442695, %v298_v43 }
 0x410   :  { %1054 = vpow2.f32 %v890_v44 }
 0x41a   :  { %v1055_v45 = vpop.eup %1054 }
 0x41b   :  { %v302_v46 = vadd.f32 1.0, %v1055_v45 }
 0x41d   :  { %1056 = vrcp.f32 %v302_v46 }
 0x427   :  { %v1057_v47 = vpop.eup %1056 }
 0x47e   :  { %v307_v48 = vpop.permute.xlu1 %306 }
 0x47f   :  { %v309_v49 = vmul.f32 %v1057_v47, %v307_v48 }
 0x481   :  { %311 = vrot.lane.b32.xlu0 %v309_v49, %s1099_s13 }
 0x4f3   :  { %v312_v50 = vpop.permute.xlu0 %311 }
 0x4f4   :  { %v314_v51 = vadd.f32 %v312_v50, %v129_v42 }
 0x4f6   :  { %1058 = vtanh.f32 %v314_v51 }
 0x500   :  { %v1059_v52 = vpop.eup %1058 }
 0x501   :  { %v316_v53 = vsub.f32 %v250_v34, %v1059_v52 }
 0x503   :  { %318 = vrot.lane.b32.xlu1 %v316_v53, %s1100_s2 }
 0x575   :  { %v319_v56 = vpop.permute.xlu1 %318 }
 0x576   :  { %v321_v57 = vmul.f32 %v1057_v47, %v319_v56 }
 0x578   :  { %323 = vrot.lane.b32.xlu0 %v321_v57, %s1101_s4 }
 0x5ea   :  { %v324_v58 = vpop.permute.xlu0 %323 }
 0x5eb   :  { %v326_v59 = vadd.f32 %v1059_v52, %v324_v58  ;;  %v142_v58 = vadd.f32 %v1199_v18, %v1232_v62 }
 0x5ed   :  { %v327_v60 = vpack.c.bf16 %v326_v59, %v326_v59 }
 0x5ef   :  { %329 = vrot.lane.b32.xlu1 %v327_v60, %s1099_s13 }
 0x661   :  { %v330_v3 = vpop.permute.xlu1 %329 }
 0x662   :  { %973 = vmatmul.mubr.msk.bf16.vlgmr.msra.gmra.mrb[8].mxu0 %vm78_vm1, %v330_v3 }
 0x663   :  { %985 = vmatpush3.bf16.msra.mxu0 %v1152_v2  ;;  %988 = vmatprep.mubr.msk.bf16.mxu0 %vm1097_vm0, %v1096_v0 }
 0x664   :  { %986 = vmatprep.subr.bf16.mxu0 %v1096_v0 }
 0x667   :  { %987 = vmatpush3.bf16.msra.mxu0 %v1161_v4 }
 0x668   :  { %1000 = vmatprep.subr.bf16.mxu0 %v1096_v0 }
 0x735   :  { %v368_v5 = vpop.f32.mrb[8].mxu0 }
 0x736   :  { %v369_v6 = vadd.f32 %v1188_v8, %v368_v5  ;;  %v974_v7 = vpop.f32.mrb[9].mxu0 }
 0x737   :  { %v371_v9 = vpop.f32.mrb[10].mxu0 }
 0x738   :  { %382 = vrot.lane.b32.xlu0 %v369_v6, %s1099_s13  ;;  %v975_v11 = vpop.f32.mrb[11].mxu0  ;;  %v374_v13 = vadd.f32 %v369_v6, %v134_v12 }
 0x73a   :  { %v892_v14 = vmul.f32 -1.442695, %v374_v13 }
 0x73c   :  { %1060 = vpow2.f32 %v892_v14 }
 0x746   :  { %v1061_v16 = vpop.eup %1060 }
 0x747   :  { %v378_v17 = vadd.f32 1.0, %v1061_v16 }
 0x749   :  { %1062 = vrcp.f32 %v378_v17 }
 0x753   :  { %v1063_v19 = vpop.eup %1062 }
 0x7aa   :  { %v383_v20 = vpop.permute.xlu0 %382 }
 0x7ab   :  { %v385_v21 = vmul.f32 %v1063_v19, %v383_v20 }
 0x7ad   :  { %387 = vrot.lane.b32.xlu1 %v385_v21, %s1099_s13 }
 0x81f   :  { %v388_v22 = vpop.permute.xlu1 %387 }
 0x820   :  { %v390_v23 = vadd.f32 %v388_v22, %v134_v12 }
 0x822   :  { %1064 = vtanh.f32 %v390_v23 }
 0x82c   :  { %v1065_v24 = vpop.eup %1064 }
 0x82d   :  { %v392_v25 = vsub.f32 %v326_v59, %v1065_v24 }
 0x82f   :  { %394 = vrot.lane.b32.xlu0 %v392_v25, %s1100_s2 }
 0x8a1   :  { %v395_v26 = vpop.permute.xlu0 %394 }
 0x8a2   :  { %v397_v10 = vmul.f32 %v1063_v19, %v395_v26 }
 0x8a4   :  { %399 = vrot.lane.b32.xlu1 %v397_v10, %s1101_s4  ;;  %v145_v10 = vadd.f32 %v1199_v18, %v1236_v1 }
 0x916   :  { %v400_v27 = vpop.permute.xlu1 %399 }
 0x917   :  { %v402_v28 = vadd.f32 %v1065_v24, %v400_v27 }
 0x919   :  { %v403_v29 = vpack.c.bf16 %v402_v28, %v402_v28 }
 0x91b   :  { %405 = vrot.lane.b32.xlu0 %v403_v29, %s1099_s13 }
 0x98d   :  { %v406_v30 = vpop.permute.xlu0 %405 }
 0x98e   :  { %981 = vmatmul.mubr.msk.bf16.vlgmr.msra.gmra.mrb[8].mxu1 %vm78_vm1, %v406_v30 }
 0x98f   :  { %993 = vmatpush3.bf16.msra.mxu1 %v1152_v2  ;;  %996 = vmatprep.mubr.msk.bf16.mxu1 %vm1097_vm0, %v1096_v0 }
 0x990   :  { %994 = vmatprep.subr.bf16.mxu1 %v1096_v0 }
 0x993   :  { %995 = vmatpush3.bf16.msra.mxu1 %v1161_v4 }
 0x994   :  { %1008 = vmatprep.subr.bf16.mxu1 %v1096_v0 }
 0xa61   :  { %v444_v31 = vpop.f32.mrb[8].mxu1 }
 0xa62   :  { %v445_v32 = vadd.f32 %v1188_v8, %v444_v31  ;;  %v982_v33 = vpop.f32.mrb[9].mxu1 }
 0xa63   :  { %v447_v34 = vpop.f32.mrb[10].mxu1 }
 0xa64   :  { %458 = vrot.lane.b32.xlu1 %v445_v32, %s1099_s13  ;;  %v983_v35 = vpop.f32.mrb[11].mxu1  ;;  %v450_v37 = vadd.f32 %v445_v32, %v137_v36 }
 0xa66   :  { %v894_v38 = vmul.f32 -1.442695, %v450_v37 }
 0xa68   :  { %1066 = vpow2.f32 %v894_v38 }
 0xa72   :  { %v1067_v39 = vpop.eup %1066 }
 0xa73   :  { %v454_v40 = vadd.f32 1.0, %v1067_v39 }
 0xa75   :  { %1068 = vrcp.f32 %v454_v40 }
 0xa7f   :  { %v1069_v41 = vpop.eup %1068 }
 0xad6   :  { %v459_v42 = vpop.permute.xlu1 %458 }
 0xad7   :  { %v461_v43 = vmul.f32 %v1069_v41, %v459_v42 }
 0xad9   :  { %463 = vrot.lane.b32.xlu0 %v461_v43, %s1099_s13 }
 0xb4b   :  { %v464_v44 = vpop.permute.xlu0 %463 }
 0xb4c   :  { %v466_v45 = vadd.f32 %v464_v44, %v137_v36 }
 0xb4e   :  { %1070 = vtanh.f32 %v466_v45 }
 0xb58   :  { %v1071_v46 = vpop.eup %1070 }
 0xb59   :  { %v468_v47 = vsub.f32 %v402_v28, %v1071_v46 }
 0xb5b   :  { %470 = vrot.lane.b32.xlu1 %v468_v47, %s1100_s2 }
 0xbcd   :  { %v471_v48 = vpop.permute.xlu1 %470 }
 0xbce   :  { %v473_v15 = vmul.f32 %v1069_v41, %v471_v48 }
 0xbd0   :  { %475 = vrot.lane.b32.xlu0 %v473_v15, %s1101_s4 }
 0xc42   :  { %v476_v49 = vpop.permute.xlu0 %475 }
 0xc43   :  { %v478_v50 = vadd.f32 %v1071_v46, %v476_v49  ;;  %v150_v46 = vadd.f32 %v1230_v61, %v1199_v18 }
 0xc45   :  { %v479_v51 = vpack.c.bf16 %v478_v50, %v478_v50 }
 0xc47   :  { %481 = vrot.lane.b32.xlu1 %v479_v51, %s1099_s13 }
 0xcb9   :  { %v482_v52 = vpop.permute.xlu1 %481 }
 0xcba   :  { %989 = vmatmul.mubr.msk.bf16.vlgmr.msra.gmra.mrb[12].mxu0 %vm78_vm1, %v482_v52 }
 0xcbb   :  { %1001 = vmatpush3.bf16.msra.mxu0 %v1152_v2  ;;  %1004 = vmatprep.mubr.msk.bf16.mxu0 %vm1097_vm0, %v1096_v0 }
 0xcbc   :  { %1002 = vmatprep.subr.bf16.mxu0 %v1096_v0 }
 0xcbf   :  { %1003 = vmatpush3.bf16.msra.mxu0 %v1161_v4 }
 0xd8d   :  { %v520_v53 = vpop.f32.mrb[12].mxu0 }
 0xd8e   :  { %v521_v54 = vadd.f32 %v1188_v8, %v520_v53  ;;  %v990_v55 = vpop.f32.mrb[13].mxu0 }
 0xd8f   :  { %v523_v56 = vpop.f32.mrb[14].mxu0 }
 0xd90   :  { %534 = vrot.lane.b32.xlu0 %v521_v54, %s1099_s13  ;;  %v991_v57 = vpop.f32.mrb[15].mxu0  ;;  %v526_v59 = vadd.f32 %v521_v54, %v142_v58 }
 0xd92   :  { %v896_v60 = vmul.f32 -1.442695, %v526_v59 }
 0xd94   :  { %1072 = vpow2.f32 %v896_v60 }
 0xd9e   :  { %v1073_v3 = vpop.eup %1072 }
 0xd9f   :  { %v530_v5 = vadd.f32 1.0, %v1073_v3 }
 0xda1   :  { %1074 = vrcp.f32 %v530_v5 }
 0xdab   :  { %v1075_v6 = vpop.eup %1074 }
 0xe02   :  { %v535_v7 = vpop.permute.xlu0 %534 }
 0xe03   :  { %v537_v9 = vmul.f32 %v1075_v6, %v535_v7 }
 0xe05   :  { %539 = vrot.lane.b32.xlu1 %v537_v9, %s1099_s13 }
 0xe77   :  { %v540_v11 = vpop.permute.xlu1 %539 }
 0xe78   :  { %v542_v12 = vadd.f32 %v540_v11, %v142_v58  ;;  %v153_v11 = vadd.f32 %v1234_v63, %v1199_v18  ;;  %v783_v18 = vld [vmem:[%s1341_s5] sm:$0xff]  ;;  %v784_v63 = vld [vmem:[%s1341_s5 + $0x8] sm:$0xff] }
 0xe7a   :  { %1076 = vtanh.f32 %v542_v12 }
 0xe84   :  { %v1077_v13 = vpop.eup %1076 }
 0xe85   :  { %v544_v14 = vsub.f32 %v478_v50, %v1077_v13 }
 0xe87   :  { %546 = vrot.lane.b32.xlu0 %v544_v14, %s1100_s2 }
 0xef9   :  { %v547_v16 = vpop.permute.xlu0 %546 }
 0xefa   :  { %v549_v62 = vmul.f32 %v1075_v6, %v547_v16 }
 0xefc   :  { %551 = vrot.lane.b32.xlu1 %v549_v62, %s1101_s4 }
 0xf6e   :  { %v552_v17 = vpop.permute.xlu1 %551 }
 0xf6f   :  { %v554_v19 = vadd.f32 %v1077_v13, %v552_v17 }
 0xf71   :  { %v555_v20 = vpack.c.bf16 %v554_v19, %v554_v19 }
 0xf73   :  { %557 = vrot.lane.b32.xlu0 %v555_v20, %s1099_s13 }
 0xfe5   :  { %v558_v21 = vpop.permute.xlu0 %557 }
 0xfe6   :  { %997 = vmatmul.mubr.msk.bf16.vlgmr.msra.gmra.mrb[12].mxu1 %vm78_vm1, %v558_v21 }
 0xfe7   :  { %1009 = vmatpush3.bf16.msra.mxu1 %v1152_v2  ;;  %1012 = vmatprep.mubr.msk.bf16.mxu1 %vm1097_vm0, %v1096_v0 }
 0xfe8   :  { %1010 = vmatprep.subr.bf16.mxu1 %v1096_v0 }
 0xfeb   :  { %1011 = vmatpush3.bf16.msra.mxu1 %v1161_v4 }
0x10b9   :  { %v596_v22 = vpop.f32.mrb[12].mxu1 }
0x10ba   :  { %v597_v23 = vadd.f32 %v1188_v8, %v596_v22  ;;  %v998_v24 = vpop.f32.mrb[13].mxu1 }
0x10bb   :  { %v599_v25 = vpop.f32.mrb[14].mxu1  ;;  %v785_v24 = vld [vmem:[%s1341_s5 + $0x10] sm:$0xff] }
0x10bc   :  { %610 = vrot.lane.b32.xlu1 %v597_v23, %s1099_s13  ;;  %v999_v26 = vpop.f32.mrb[15].mxu1  ;;  %v602_v27 = vadd.f32 %v597_v23, %v145_v10  ;;  %v1102_v23 = vmov 0.0|0.0   ;;  %v1028_v25 = vpack.c.bf16 %v784_v63, %v783_v18 }
0x10bd   :  { %1027 = vmatprep.subr.bf16.mxu0 %v1102_v23  ;;  %v786_v26 = vld [vmem:[%s1341_s5 + $0x18] sm:$0xff] }
0x10be   :  { %v898_v2 = vmul.f32 -1.442695, %v602_v27 }
0x10c0   :  { %1078 = vpow2.f32 %v898_v2 }
0x10ca   :  { %v1079_v28 = vpop.eup %1078 }
0x10cb   :  { %v606_v29 = vadd.f32 1.0, %v1079_v28 }
0x10cd   :  { %1080 = vrcp.f32 %v606_v29 }
0x10d7   :  { %v1081_v30 = vpop.eup %1080 }
0x112e   :  { %v611_v31 = vpop.permute.xlu1 %610 }
0x112f   :  { %v613_v4 = vmul.f32 %v1081_v30, %v611_v31  ;;  %v903_v31 = vld [vmem:[%s1342_s6] ss:$0 sm:$0xff] }
0x1131   :  { %615 = vrot.lane.b32.xlu0 %v613_v4, %s1099_s13 }
0x11a3   :  { %v616_v32 = vpop.permute.xlu0 %615 }
0x11a4   :  { %v618_v33 = vadd.f32 %v616_v32, %v145_v10  ;;  %v1031_v10 = vpack.c.bf16 %v786_v26, %v785_v24 }
0x11a6   :  { %1082 = vtanh.f32 %v618_v33 }
0x11b0   :  { %v1083_v34 = vpop.eup %1082 }
0x11b1   :  { %v620_v35 = vsub.f32 %v554_v19, %v1083_v34 }
0x11b3   :  { %622 = vrot.lane.b32.xlu1 %v620_v35, %s1100_s2 }
0x1225   :  { %v623_v36 = vpop.permute.xlu1 %622 }
0x1226   :  { %v625_v1 = vmul.f32 %v1081_v30, %v623_v36 }
0x1228   :  { %627 = vrot.lane.b32.xlu0 %v625_v1, %s1101_s4 }
0x129a   :  { %v628_v37 = vpop.permute.xlu0 %627 }
0x129b   :  { %v630_v38 = vadd.f32 %v1083_v34, %v628_v37 }
0x129d   :  { %v631_v39 = vpack.c.bf16 %v630_v38, %v630_v38 }
0x129f   :  { %633 = vrot.lane.b32.xlu1 %v631_v39, %s1099_s13 }
0x1311   :  { %v634_v40 = vpop.permute.xlu1 %633 }
0x1312   :  { %1005 = vmatmul.mubr.msk.bf16.vlgmr.msra.gmra.mrb[16].mxu0 %vm78_vm1, %v634_v40 }
0x1313   :  { %1024 = vmatprep.mubr.msk.f32.mxu0 %vm1097_vm0, %v1096_v0  ;;  %1029 = vmatpush3.bf16.msra.mxu0 %v1028_v25 }
0x1314   :  { %1030 = vmatprep.subr.bf16.mxu0 %v1102_v23 }
0x1317   :  { %1032 = vmatpush3.bf16.msra.mxu0 %v1031_v10 }
0x13e5   :  { %v672_v41 = vpop.f32.mrb[16].mxu0 }
0x13e6   :  { %v673_v42 = vadd.f32 %v1188_v8, %v672_v41  ;;  %v1006_v43 = vpop.f32.mrb[17].mxu0 }
0x13e7   :  { %v675_v44 = vpop.f32.mrb[18].mxu0 }
0x13e8   :  { %686 = vrot.lane.b32.xlu0 %v673_v42, %s1099_s13  ;;  %v1007_v45 = vpop.f32.mrb[19].mxu0  ;;  %v678_v47 = vadd.f32 %v673_v42, %v150_v46 }
0x13ea   :  { %v900_v48 = vmul.f32 -1.442695, %v678_v47 }
0x13ec   :  { %1084 = vpow2.f32 %v900_v48 }
0x13f6   :  { %v1085_v15 = vpop.eup %1084 }
0x13f7   :  { %v682_v49 = vadd.f32 1.0, %v1085_v15 }
0x13f9   :  { %1086 = vrcp.f32 %v682_v49 }
0x1403   :  { %v1087_v50 = vpop.eup %1086 }
0x145a   :  { %v687_v51 = vpop.permute.xlu0 %686 }
0x145b   :  { %v689_v0 = vmul.f32 %v1087_v50, %v687_v51 }
0x145d   :  { %691 = vrot.lane.b32.xlu1 %v689_v0, %s1099_s13 }
0x14cf   :  { %v692_v52 = vpop.permute.xlu1 %691 }
0x14d0   :  { %v694_v53 = vadd.f32 %v692_v52, %v150_v46 }
0x14d2   :  { %1088 = vtanh.f32 %v694_v53 }
0x14dc   :  { %v1089_v54 = vpop.eup %1088 }
0x14dd   :  { %v696_v55 = vsub.f32 %v630_v38, %v1089_v54 }
0x14df   :  { %698 = vrot.lane.b32.xlu0 %v696_v55, %s1100_s2 }
0x1551   :  { %v699_v56 = vpop.permute.xlu0 %698 }
0x1552   :  { %v701_v61 = vmul.f32 %v1087_v50, %v699_v56 }
0x1554   :  { %703 = vrot.lane.b32.xlu1 %v701_v61, %s1101_s4 }
0x15c6   :  { %v704_v57 = vpop.permute.xlu1 %703 }
0x15c7   :  { %v706_v58 = vadd.f32 %v1089_v54, %v704_v57 }
0x15c9   :  { %v707_v59 = vpack.c.bf16 %v706_v58, %v706_v58 }
0x15cb   :  { %709 = vrot.lane.b32.xlu0 %v707_v59, %s1099_s13 }
0x163d   :  { %v710_v60 = vpop.permute.xlu0 %709 }
0x163e   :  { %1013 = vmatmul.mubr.msk.bf16.vlgmr.msra.gmra.mrb[16].mxu1 %vm78_vm1, %v710_v60 }
0x1711   :  { %v748_v3 = vpop.f32.mrb[16].mxu1 }
0x1712   :  { %v749_v5 = vadd.f32 %v1188_v8, %v748_v3  ;;  %v1014_v6 = vpop.f32.mrb[17].mxu1 }
0x1713   :  { %v751_v7 = vpop.f32.mrb[18].mxu1 }
0x1714   :  { %762 = vrot.lane.b32.xlu1 %v749_v5, %s1099_s13  ;;  %v1015_v9 = vpop.f32.mrb[19].mxu1  ;;  %v754_v12 = vadd.f32 %v749_v5, %v153_v11 }
0x1716   :  { %v902_v13 = vmul.f32 -1.442695, %v754_v12 }
0x1718   :  { %1090 = vpow2.f32 %v902_v13 }
0x1722   :  { %v1091_v14 = vpop.eup %1090 }
0x1723   :  { %v758_v16 = vadd.f32 1.0, %v1091_v14 }
0x1725   :  { %1092 = vrcp.f32 %v758_v16 }
0x172f   :  { %v1093_v62 = vpop.eup %1092 }
0x1786   :  { %v763_v17 = vpop.permute.xlu1 %762 }
0x1787   :  { %v765_v19 = vmul.f32 %v1093_v62, %v763_v17 }
0x1789   :  { %767 = vrot.lane.b32.xlu0 %v765_v19, %s1099_s13 }
0x17fb   :  { %v768_v8 = vpop.permute.xlu0 %767 }
0x17fc   :  { %v770_v20 = vadd.f32 %v768_v8, %v153_v11 }
0x17fe   :  { %1094 = vtanh.f32 %v770_v20 }
0x1808   :  { %v1095_v21 = vpop.eup %1094 }
0x1809   :  { %v772_v22 = vsub.f32 %v706_v58, %v1095_v21 }
0x180b   :  { %774 = vrot.lane.b32.xlu1 %v772_v22, %s1100_s2 }
0x187d   :  { %v775_v27 = vpop.permute.xlu1 %774 }
0x187e   :  { %v777_v2 = vmul.f32 %v1093_v62, %v775_v27 }
0x1880   :  { %779 = vrot.lane.b32.xlu0 %v777_v2, %s1101_s4 }
0x18f2   :  { %v780_v28 = vpop.permute.xlu0 %779 }
0x18f3   :  { %v782_v29 = vadd.f32 %v1095_v21, %v780_v28 }
0x18f5   :  { %795 = vrot.lane.b32.xlu1 %v782_v29, %s1099_s13 }
0x1967   :  { %v796_v30 = vpop.permute.xlu1 %795 }
0x1968   :  { %1025 = vmatmul.mubr.msk.f32.vlgmr.msra.gmra.mrb[20].mxu0 %vm78_vm1, %v796_v30 }
0x1a3b   :  { %v865_v4 = vpop.f32.mrb[20].mxu0 }
0x1a3c   :  { %v866_v32 = vadd.f32 %v903_v31, %v865_v4  ;;  %v1026_v33 = vpop.f32.mrb[21].mxu0 }
0x1a3e   :  { %869 = vst.msk [vmem:[%s1343_s7] sm:$0xff] %vm78_vm1, %v866_v32 }

</bundles_post_ra>
